<compile_context>
chip_gen: v5e
topology: v5e:2x2
jax: 0.10.0
libtpu: 0.0.40
codegen_flags: <defaults>
</compile_context>

<pallas_src>
import functools

import jax
import jax.numpy as jnp
from jax.experimental import pallas as pl
from jax.experimental.pallas import tpu as pltpu

NEG_SLOPE = 0.2
BN_EPS = 1e-5


# ---------------------------------------------------------------------------
# helpers
# ---------------------------------------------------------------------------
def _round_up(x, m):
    return ((x + m - 1) // m) * m


def _num_core_splits():
    """2 on v7x (2 TensorCores/chip) so the conv+stats grid can megacore-split;
    1 elsewhere (v5e/v6e are single-TC, a split would only add grid steps)."""
    try:
        kind = jax.devices()[0].device_kind.lower()
    except Exception:
        return 1
    return 2 if ("v7" in kind or "7x" in kind) else 1


def _vmem_limit_bytes(*per_buffer_bytes):
    """Explicit scoped-VMEM budget: double-buffered blocks + slack, capped well
    below the 64 MiB physical VMEM of a v7x TensorCore."""
    need = 2 * sum(per_buffer_bytes) + (2 << 20)
    return int(min(max(need, 32 << 20), 48 << 20))


# ---------------------------------------------------------------------------
# Pallas kernels
# ---------------------------------------------------------------------------
def _conv_stats_kernel(w_ref, p_ref, y_ref, sum_ref, ssq_ref, *,
                       m_total, tm, tiles_per_split, mask_tail):
    """One M-tile of y = Wt @ patches, plus running per-channel sum / sumsq."""
    s = pl.program_id(0)          # megacore split (v7x); extent 1 on v5e/v6e
    i = pl.program_id(1)          # M-tile within the split

    p = p_ref[...]
    if mask_tail:                 # static: only emitted when M % tm != 0
        start = (s * tiles_per_split + i) * tm
        col = jax.lax.broadcasted_iota(jnp.int32, (1, tm), 1) + start
        p = jnp.where(col < m_total, p, 0.0)

    # (C, K) @ (K, tm) -> (C, tm): M on lanes => lane-dense output stores.
    y = jnp.dot(w_ref[...], p, preferred_element_type=jnp.float32)
    y_ref[...] = y

    @pl.when(i == 0)
    def _():
        sum_ref[...] = jnp.zeros_like(sum_ref)
        ssq_ref[...] = jnp.zeros_like(ssq_ref)

    # cross-lane reductions (XLU slot) for BatchNorm batch statistics.
    sum_ref[...] += jnp.sum(y, axis=1, keepdims=True)[None]
    ssq_ref[...] += jnp.sum(y * y, axis=1, keepdims=True)[None]


def _bn_lrelu_kernel(y_ref, scale_ref, shift_ref, o_ref):
    """Fused BatchNorm affine apply + LeakyReLU(0.2), lane-dense, in place."""
    y = y_ref[...] * scale_ref[...] + shift_ref[...]
    o_ref[...] = jnp.where(y >= 0.0, y, NEG_SLOPE * y)


# ---------------------------------------------------------------------------
# Pallas wrappers
# ---------------------------------------------------------------------------
def conv_matmul_with_stats(w_t, patches, tm=512):
    """w_t: [C, K], patches: [K, M] -> (y [C, M], psum [S, C, 1], pssq [S, C, 1])."""
    C, K = w_t.shape
    K2, M = patches.shape
    assert K == K2
    tm = min(_round_up(tm, 128), _round_up(M, 128))   # big, 128-aligned lane tile
    tiles = pl.cdiv(M, tm)

    n_split = _num_core_splits()
    if tiles % n_split != 0:                          # only split when exact
        n_split = 1
    tiles_per_split = tiles // n_split
    mask_tail = (M % tm) != 0

    kernel = functools.partial(
        _conv_stats_kernel, m_total=M, tm=tm,
        tiles_per_split=tiles_per_split, mask_tail=mask_tail)

    y, psum, pssq = pl.pallas_call(
        kernel,
        out_shape=(
            jax.ShapeDtypeStruct((C, M), jnp.float32),
            jax.ShapeDtypeStruct((n_split, C, 1), jnp.float32),
            jax.ShapeDtypeStruct((n_split, C, 1), jnp.float32),
        ),
        grid_spec=pltpu.PrefetchScalarGridSpec(
            num_scalar_prefetch=0,
            grid=(n_split, tiles_per_split),
            in_specs=[
                pl.BlockSpec((C, K), lambda s, i: (0, 0)),            # resident weight
                pl.BlockSpec((K, tm), lambda s, i: (0, s * tiles_per_split + i)),
            ],
            out_specs=(
                pl.BlockSpec((C, tm), lambda s, i: (0, s * tiles_per_split + i)),
                pl.BlockSpec((1, C, 1), lambda s, i: (s, 0, 0)),      # per-split accum
                pl.BlockSpec((1, C, 1), lambda s, i: (s, 0, 0)),      # per-split accum
            ),
        ),
        compiler_params=pltpu.CompilerParams(
            dimension_semantics=("parallel", "arbitrary"),
            vmem_limit_bytes=_vmem_limit_bytes(K * tm * 4, C * tm * 4, C * K * 4),
        ),
    )(w_t, patches)
    return y, psum, pssq


def bn_lrelu(y, scale, shift, tm=1024):
    """y: [C, M]; scale/shift: [C] -> LeakyReLU(y*scale + shift), in place."""
    C, M = y.shape
    tm = min(_round_up(tm, 128), _round_up(M, 128))
    tiles = pl.cdiv(M, tm)

    out = pl.pallas_call(
        _bn_lrelu_kernel,
        out_shape=jax.ShapeDtypeStruct((C, M), jnp.float32),
        grid_spec=pltpu.PrefetchScalarGridSpec(
            num_scalar_prefetch=0,
            grid=(tiles,),
            in_specs=[
                pl.BlockSpec((C, tm), lambda i: (0, i)),
                pl.BlockSpec((C, 1), lambda i: (0, 0)),
                pl.BlockSpec((C, 1), lambda i: (0, 0)),
            ],
            out_specs=pl.BlockSpec((C, tm), lambda i: (0, i)),
        ),
        input_output_aliases={0: 0},                  # write y in place
        compiler_params=pltpu.CompilerParams(
            dimension_semantics=("parallel",),
            vmem_limit_bytes=_vmem_limit_bytes(C * tm * 4, C * tm * 4),
        ),
    )(y, scale.reshape(C, 1), shift.reshape(C, 1))
    return out


# ---------------------------------------------------------------------------
# Plain-JAX glue (channel-major layout: activations are [C, N, H, W])
# ---------------------------------------------------------------------------
def extract_patches_cm(x_cm, kh, kw, stride, pad):
    """Channel-major im2col: x [C, N, H, W] -> patches [kh*kw*C, N*Ho*Wo]."""
    C, N, H, W = x_cm.shape
    xp = jnp.pad(x_cm, ((0, 0), (0, 0), (pad, pad), (pad, pad)))
    Ho = (H + 2 * pad - kh) // stride + 1
    Wo = (W + 2 * pad - kw) // stride + 1
    taps = []
    for ki in range(kh):
        for kj in range(kw):
            taps.append(xp[:, :, ki:ki + stride * Ho:stride,
                              kj:kj + stride * Wo:stride])
    # TODO(synk): form these patches inside the conv kernel from halo'ed input
    # blocks to avoid the kh*kw-fold im2col duplication in HBM.
    p = jnp.stack(taps, axis=0)                       # [kh*kw, C, N, Ho, Wo]
    return p.reshape(kh * kw * C, N * Ho * Wo), (N, Ho, Wo)


def _stage(x_cm, w_hwio, gamma, beta, kh, kw, stride, pad):
    p, (N, Ho, Wo) = extract_patches_cm(x_cm, kh, kw, stride, pad)
    K, M = p.shape
    C = w_hwio.shape[3]
    w_t = w_hwio.reshape(K, C).T                      # [C, K]

    y, psum, pssq = conv_matmul_with_stats(w_t, p)    # y: [C, M]

    csum = jnp.sum(psum, axis=0)[:, 0]                # reduce megacore partials
    cssq = jnp.sum(pssq, axis=0)[:, 0]
    mean = csum / M                                   # training-mode batch stats
    var = jnp.maximum(cssq / M - mean * mean, 0.0)    # guard E[y^2]-m^2 cancellation
    scale = gamma * jax.lax.rsqrt(var + BN_EPS)
    shift = beta - mean * scale

    y = bn_lrelu(y, scale, shift)
    return y.reshape(C, N, Ho, Wo)


def downsample1_forward(x_nchw, params):
    x = jnp.transpose(x_nchw, (1, 0, 2, 3))           # NCHW -> [C, N, H, W]
    x = _stage(x, params["w1"], params["gamma1"], params["beta1"], 4, 4, 2, 1)
    x = _stage(x, params["w2"], params["gamma2"], params["beta2"], 3, 3, 1, 1)
    return jnp.transpose(x, (1, 0, 2, 3))             # [C, N, H, W] -> NCHW


# ---------------------------------------------------------------------------
# Pure-JAX reference (for correctness check only)
# ---------------------------------------------------------------------------
def reference_forward(x_nchw, params):
    x = jnp.transpose(x_nchw, (0, 2, 3, 1))

    def conv(x, w, stride, pad):
        return jax.lax.conv_general_dilated(
            x, w, window_strides=(stride, stride),
            padding=[(pad, pad), (pad, pad)],
            dimension_numbers=("NHWC", "HWIO", "NHWC"))

    def bn_lrelu_ref(y, gamma, beta):
        mean = jnp.mean(y, axis=(0, 1, 2))
        var = jnp.mean((y - mean) ** 2, axis=(0, 1, 2))
        yh = (y - mean) / jnp.sqrt(var + BN_EPS) * gamma + beta
        return jnp.where(yh >= 0, yh, NEG_SLOPE * yh)

    y = conv(x, params["w1"], 2, 1)
    y = bn_lrelu_ref(y, params["gamma1"], params["beta1"])
    y = conv(y, params["w2"], 1, 1)
    y = bn_lrelu_ref(y, params["gamma2"], params["beta2"])
    return jnp.transpose(y, (0, 3, 1, 2))


# ---------------------------------------------------------------------------
if __name__ == "__main__":
    c_in, c_out = 4, 8
    N, H, W = 2, 16, 16

    key = jax.random.PRNGKey(0)
    kx, kw1, kw2, kg1, kb1, kg2, kb2 = jax.random.split(key, 7)

    x = jax.random.normal(kx, (N, c_in, H, W), dtype=jnp.float32)  # NCHW like PyTorch
    params = {
        "w1": 0.1 * jax.random.normal(kw1, (4, 4, c_in, c_out), dtype=jnp.float32),
        "w2": 0.1 * jax.random.normal(kw2, (3, 3, c_out, c_out), dtype=jnp.float32),
        "gamma1": 1.0 + 0.1 * jax.random.normal(kg1, (c_out,), dtype=jnp.float32),
        "beta1": 0.1 * jax.random.normal(kb1, (c_out,), dtype=jnp.float32),
        "gamma2": 1.0 + 0.1 * jax.random.normal(kg2, (c_out,), dtype=jnp.float32),
        "beta2": 0.1 * jax.random.normal(kb2, (c_out,), dtype=jnp.float32),
    }

    out = jax.jit(downsample1_forward)(x, params)
    out = jax.block_until_ready(out)

    ref = jax.block_until_ready(reference_forward(x, params))
    assert out.shape == (N, c_out, H // 2, W // 2), out.shape
    assert jnp.allclose(out, ref, atol=1e-4, rtol=1e-4), float(jnp.max(jnp.abs(out - ref)))

    print("KERNEL_OK")
</pallas_src>

<mosaic_0001>
module attributes {stable_mosaic.version = 11 : i64} {
  func.func @_conv_stats_kernel(%arg0: i32, %arg1: i32, %arg2: memref<8x64xf32, #tpu.memory_space<vmem>>, %arg3: memref<64x128xf32, #tpu.memory_space<vmem>>, %arg4: memref<8x128xf32, #tpu.memory_space<vmem>>, %arg5: memref<1x8x1xf32, #tpu.memory_space<vmem>>, %arg6: memref<1x8x1xf32, #tpu.memory_space<vmem>>) attributes {dimension_semantics = [#tpu.dimension_semantics<parallel>, #tpu.dimension_semantics<arbitrary>], iteration_bounds = array<i64: 1, 1>, scalar_prefetch = 0 : i64, scratch_operands = 0 : i64, tpu.core_type = #tpu.core_type<tc>, window_params = [{pipeline_mode = #tpu.pipeline_mode<synchronous>, transform_indices = @transform_0, window_bounds = array<i64: 8, 64>}, {transform_indices = @transform_1, window_bounds = array<i64: 64, 128>}, {transform_indices = @transform_2, window_bounds = array<i64: 8, 128>}, {transform_indices = @transform_3, window_bounds = array<i64: 1, 8, 1>}, {transform_indices = @transform_4, window_bounds = array<i64: 1, 8, 1>}]} {
    %c0 = arith.constant 0 : index
    %c0_0 = arith.constant 0 : index
    %0 = vector.load %arg3[%c0, %c0_0] : memref<64x128xf32, #tpu.memory_space<vmem>>, vector<64x128xf32>
    %c0_1 = arith.constant 0 : index
    %c0_2 = arith.constant 0 : index
    %1 = vector.load %arg2[%c0_1, %c0_2] : memref<8x64xf32, #tpu.memory_space<vmem>>, vector<8x64xf32>
    %cst = arith.constant dense<0.000000e+00> : vector<8x128xf32>
    %2 = tpu.matmul %1, %0, %cst {dimension_numbers = #tpu.dot_dimension_numbers<[1], [0], [0], [1], [0, 0, 1, 1], [], []>} : vector<8x64xf32>, vector<64x128xf32>, vector<8x128xf32> -> vector<8x128xf32>
    %c0_3 = arith.constant 0 : index
    %c0_4 = arith.constant 0 : index
    %3 = vector.load %arg4[%c0_3, %c0_4] : memref<8x128xf32, #tpu.memory_space<vmem>>, vector<8x128xf32>
    tpu.vector_store %arg4[%c0_3, %c0_4], %2 {strides = array<i32>} : memref<8x128xf32, #tpu.memory_space<vmem>>, vector<8x128xf32>,
    %c0_i32 = arith.constant 0 : i32
    %4 = arith.cmpi eq, %arg1, %c0_i32 : i32
    %5 = arith.extui %4 : i1 to i32
    %c0_i32_5 = arith.constant 0 : i32
    %6 = arith.cmpi ne, %5, %c0_i32_5 : i32
    scf.if %6 {
      %cst_20 = arith.constant 0.000000e+00 : f32
      %20 = vector.broadcast %cst_20 : f32 to vector<1x8x1xf32>
      %c0_21 = arith.constant 0 : index
      %c0_22 = arith.constant 0 : index
      %c0_23 = arith.constant 0 : index
      %21 = vector.load %arg5[%c0_21, %c0_22, %c0_23] : memref<1x8x1xf32, #tpu.memory_space<vmem>>, vector<1x8x1xf32>
      tpu.vector_store %arg5[%c0_21, %c0_22, %c0_23], %20 {strides = array<i32>} : memref<1x8x1xf32, #tpu.memory_space<vmem>>, vector<1x8x1xf32>,
      %cst_24 = arith.constant 0.000000e+00 : f32
      %22 = vector.broadcast %cst_24 : f32 to vector<1x8x1xf32>
      %c0_25 = arith.constant 0 : index
      %c0_26 = arith.constant 0 : index
      %c0_27 = arith.constant 0 : index
      %23 = vector.load %arg6[%c0_25, %c0_26, %c0_27] : memref<1x8x1xf32, #tpu.memory_space<vmem>>, vector<1x8x1xf32>
      tpu.vector_store %arg6[%c0_25, %c0_26, %c0_27], %22 {strides = array<i32>} : memref<1x8x1xf32, #tpu.memory_space<vmem>>, vector<1x8x1xf32>,
    } else {
    }
    %c0_6 = arith.constant 0 : index
    %c0_7 = arith.constant 0 : index
    %c0_8 = arith.constant 0 : index
    %7 = vector.load %arg5[%c0_6, %c0_7, %c0_8] : memref<1x8x1xf32, #tpu.memory_space<vmem>>, vector<1x8x1xf32>
    %cst_9 = arith.constant dense<0.000000e+00> : vector<8xf32>
    %8 = vector.multi_reduction <add>, %2, %cst_9 [1] : vector<8x128xf32> to vector<8xf32>
    %9 = vector.shape_cast %8 : vector<8xf32> to vector<8x1xf32>
    %10 = vector.shape_cast %9 : vector<8x1xf32> to vector<1x8x1xf32>
    %11 = arith.addf %7, %10 : vector<1x8x1xf32>
    %c0_10 = arith.constant 0 : index
    %c0_11 = arith.constant 0 : index
    %c0_12 = arith.constant 0 : index
    %12 = vector.load %arg5[%c0_10, %c0_11, %c0_12] : memref<1x8x1xf32, #tpu.memory_space<vmem>>, vector<1x8x1xf32>
    tpu.vector_store %arg5[%c0_10, %c0_11, %c0_12], %11 {strides = array<i32>} : memref<1x8x1xf32, #tpu.memory_space<vmem>>, vector<1x8x1xf32>,
    %c0_13 = arith.constant 0 : index
    %c0_14 = arith.constant 0 : index
    %c0_15 = arith.constant 0 : index
    %13 = vector.load %arg6[%c0_13, %c0_14, %c0_15] : memref<1x8x1xf32, #tpu.memory_space<vmem>>, vector<1x8x1xf32>
    %14 = arith.mulf %2, %2 : vector<8x128xf32>
    %cst_16 = arith.constant dense<0.000000e+00> : vector<8xf32>
    %15 = vector.multi_reduction <add>, %14, %cst_16 [1] : vector<8x128xf32> to vector<8xf32>
    %16 = vector.shape_cast %15 : vector<8xf32> to vector<8x1xf32>
    %17 = vector.shape_cast %16 : vector<8x1xf32> to vector<1x8x1xf32>
    %18 = arith.addf %13, %17 : vector<1x8x1xf32>
    %c0_17 = arith.constant 0 : index
    %c0_18 = arith.constant 0 : index
    %c0_19 = arith.constant 0 : index
    %19 = vector.load %arg6[%c0_17, %c0_18, %c0_19] : memref<1x8x1xf32, #tpu.memory_space<vmem>>, vector<1x8x1xf32>
    tpu.vector_store %arg6[%c0_17, %c0_18, %c0_19], %18 {strides = array<i32>} : memref<1x8x1xf32, #tpu.memory_space<vmem>>, vector<1x8x1xf32>,
    return
  }
  func.func @transform_0(%arg0: i32, %arg1: i32) -> (i32, i32) {
    %c0_i32 = arith.constant 0 : i32
    %c0_i32_0 = arith.constant 0 : i32
    %c0_i32_1 = arith.constant 0 : i32
    return %c0_i32, %c0_i32_0 : i32, i32
  }
  func.func @transform_1(%arg0: i32, %arg1: i32) -> (i32, i32) {
    %c1_i32 = arith.constant 1 : i32
    %0 = arith.muli %arg0, %c1_i32 : i32
    %1 = arith.addi %0, %arg1 : i32
    %c0_i32 = arith.constant 0 : i32
    %c0_i32_0 = arith.constant 0 : i32
    return %c0_i32, %1 : i32, i32
  }
  func.func @transform_2(%arg0: i32, %arg1: i32) -> (i32, i32) {
    %c1_i32 = arith.constant 1 : i32
    %0 = arith.muli %arg0, %c1_i32 : i32
    %1 = arith.addi %0, %arg1 : i32
    %c0_i32 = arith.constant 0 : i32
    %c0_i32_0 = arith.constant 0 : i32
    return %c0_i32, %1 : i32, i32
  }
  func.func @transform_3(%arg0: i32, %arg1: i32) -> (i32, i32, i32) {
    %c0_i32 = arith.constant 0 : i32
    %c0_i32_0 = arith.constant 0 : i32
    %c0_i32_1 = arith.constant 0 : i32
    return %arg0, %c0_i32, %c0_i32_0 : i32, i32, i32
  }
  func.func @transform_4(%arg0: i32, %arg1: i32) -> (i32, i32, i32) {
    %c0_i32 = arith.constant 0 : i32
    %c0_i32_0 = arith.constant 0 : i32
    %c0_i32_1 = arith.constant 0 : i32
    return %arg0, %c0_i32, %c0_i32_0 : i32, i32, i32
  }
}

module attributes {stable_mosaic.version = 11 : i64} {
  func.func @_bn_lrelu_kernel(%arg0: i32, %arg1: memref<8x128xf32, #tpu.memory_space<vmem>>, %arg2: memref<8x1xf32, #tpu.memory_space<vmem>>, %arg3: memref<8x1xf32, #tpu.memory_space<vmem>>, %arg4: memref<8x128xf32, #tpu.memory_space<vmem>>) attributes {dimension_semantics = [#tpu.dimension_semantics<parallel>], iteration_bounds = array<i64: 1>, scalar_prefetch = 0 : i64, scratch_operands = 0 : i64, tpu.core_type = #tpu.core_type<tc>, window_params = [{transform_indices = @transform_0, window_bounds = array<i64: 8, 128>}, {pipeline_mode = #tpu.pipeline_mode<synchronous>, transform_indices = @transform_1, window_bounds = array<i64: 8, 1>}, {pipeline_mode = #tpu.pipeline_mode<synchronous>, transform_indices = @transform_2, window_bounds = array<i64: 8, 1>}, {transform_indices = @transform_3, window_bounds = array<i64: 8, 128>}]} {
    %c0 = arith.constant 0 : index
    %c0_0 = arith.constant 0 : index
    %0 = vector.load %arg1[%c0, %c0_0] : memref<8x128xf32, #tpu.memory_space<vmem>>, vector<8x128xf32>
    %c0_1 = arith.constant 0 : index
    %c0_2 = arith.constant 0 : index
    %1 = vector.load %arg2[%c0_1, %c0_2] : memref<8x1xf32, #tpu.memory_space<vmem>>, vector<8x1xf32>
    %2 = vector.broadcast %1 : vector<8x1xf32> to vector<8x128xf32>
    %3 = arith.mulf %0, %2 : vector<8x128xf32>
    %c0_3 = arith.constant 0 : index
    %c0_4 = arith.constant 0 : index
    %4 = vector.load %arg3[%c0_3, %c0_4] : memref<8x1xf32, #tpu.memory_space<vmem>>, vector<8x1xf32>
    %5 = vector.broadcast %4 : vector<8x1xf32> to vector<8x128xf32>
    %6 = arith.addf %3, %5 : vector<8x128xf32>
    %cst = arith.constant 0.000000e+00 : f32
    %7 = vector.broadcast %cst : f32 to vector<8x128xf32>
    %8 = arith.cmpf oge, %6, %7 : vector<8x128xf32>
    %cst_5 = arith.constant 2.000000e-01 : f32
    %9 = vector.broadcast %cst_5 : f32 to vector<8x128xf32>
    %10 = arith.mulf %9, %6 : vector<8x128xf32>
    %11 = arith.select %8, %6, %10 : vector<8x128xi1>, vector<8x128xf32>
    %c0_6 = arith.constant 0 : index
    %c0_7 = arith.constant 0 : index
    %12 = vector.load %arg4[%c0_6, %c0_7] : memref<8x128xf32, #tpu.memory_space<vmem>>, vector<8x128xf32>
    tpu.vector_store %arg4[%c0_6, %c0_7], %11 {strides = array<i32>} : memref<8x128xf32, #tpu.memory_space<vmem>>, vector<8x128xf32>,
    return
  }
  func.func @transform_0(%arg0: i32) -> (i32, i32) {
    %c0_i32 = arith.constant 0 : i32
    %c0_i32_0 = arith.constant 0 : i32
    return %c0_i32, %arg0 : i32, i32
  }
  func.func @transform_1(%arg0: i32) -> (i32, i32) {
    %c0_i32 = arith.constant 0 : i32
    %c0_i32_0 = arith.constant 0 : i32
    %c0_i32_1 = arith.constant 0 : i32
    return %c0_i32, %c0_i32_0 : i32, i32
  }
  func.func @transform_2(%arg0: i32) -> (i32, i32) {
    %c0_i32 = arith.constant 0 : i32
    %c0_i32_0 = arith.constant 0 : i32
    %c0_i32_1 = arith.constant 0 : i32
    return %c0_i32, %c0_i32_0 : i32, i32
  }
  func.func @transform_3(%arg0: i32) -> (i32, i32) {
    %c0_i32 = arith.constant 0 : i32
    %c0_i32_0 = arith.constant 0 : i32
    return %c0_i32, %arg0 : i32, i32
  }
}

module attributes {stable_mosaic.version = 11 : i64} {
  func.func @_conv_stats_kernel(%arg0: i32, %arg1: i32, %arg2: memref<8x72xf32, #tpu.memory_space<vmem>>, %arg3: memref<72x128xf32, #tpu.memory_space<vmem>>, %arg4: memref<8x128xf32, #tpu.memory_space<vmem>>, %arg5: memref<1x8x1xf32, #tpu.memory_space<vmem>>, %arg6: memref<1x8x1xf32, #tpu.memory_space<vmem>>) attributes {dimension_semantics = [#tpu.dimension_semantics<parallel>, #tpu.dimension_semantics<arbitrary>], iteration_bounds = array<i64: 1, 1>, scalar_prefetch = 0 : i64, scratch_operands = 0 : i64, tpu.core_type = #tpu.core_type<tc>, window_params = [{pipeline_mode = #tpu.pipeline_mode<synchronous>, transform_indices = @transform_0, window_bounds = array<i64: 8, 72>}, {transform_indices = @transform_1, window_bounds = array<i64: 72, 128>}, {transform_indices = @transform_2, window_bounds = array<i64: 8, 128>}, {transform_indices = @transform_3, window_bounds = array<i64: 1, 8, 1>}, {transform_indices = @transform_4, window_bounds = array<i64: 1, 8, 1>}]} {
    %c0 = arith.constant 0 : index
    %c0_0 = arith.constant 0 : index
    %0 = vector.load %arg3[%c0, %c0_0] : memref<72x128xf32, #tpu.memory_space<vmem>>, vector<72x128xf32>
    %c0_1 = arith.constant 0 : index
    %c0_2 = arith.constant 0 : index
    %1 = vector.load %arg2[%c0_1, %c0_2] : memref<8x72xf32, #tpu.memory_space<vmem>>, vector<8x72xf32>
    %cst = arith.constant dense<0.000000e+00> : vector<8x128xf32>
    %2 = tpu.matmul %1, %0, %cst {dimension_numbers = #tpu.dot_dimension_numbers<[1], [0], [0], [1], [0, 0, 1, 1], [], []>} : vector<8x72xf32>, vector<72x128xf32>, vector<8x128xf32> -> vector<8x128xf32>
    %c0_3 = arith.constant 0 : index
    %c0_4 = arith.constant 0 : index
    %3 = vector.load %arg4[%c0_3, %c0_4] : memref<8x128xf32, #tpu.memory_space<vmem>>, vector<8x128xf32>
    tpu.vector_store %arg4[%c0_3, %c0_4], %2 {strides = array<i32>} : memref<8x128xf32, #tpu.memory_space<vmem>>, vector<8x128xf32>,
    %c0_i32 = arith.constant 0 : i32
    %4 = arith.cmpi eq, %arg1, %c0_i32 : i32
    %5 = arith.extui %4 : i1 to i32
    %c0_i32_5 = arith.constant 0 : i32
    %6 = arith.cmpi ne, %5, %c0_i32_5 : i32
    scf.if %6 {
      %cst_20 = arith.constant 0.000000e+00 : f32
      %20 = vector.broadcast %cst_20 : f32 to vector<1x8x1xf32>
      %c0_21 = arith.constant 0 : index
      %c0_22 = arith.constant 0 : index
      %c0_23 = arith.constant 0 : index
      %21 = vector.load %arg5[%c0_21, %c0_22, %c0_23] : memref<1x8x1xf32, #tpu.memory_space<vmem>>, vector<1x8x1xf32>
      tpu.vector_store %arg5[%c0_21, %c0_22, %c0_23], %20 {strides = array<i32>} : memref<1x8x1xf32, #tpu.memory_space<vmem>>, vector<1x8x1xf32>,
      %cst_24 = arith.constant 0.000000e+00 : f32
      %22 = vector.broadcast %cst_24 : f32 to vector<1x8x1xf32>
      %c0_25 = arith.constant 0 : index
      %c0_26 = arith.constant 0 : index
      %c0_27 = arith.constant 0 : index
      %23 = vector.load %arg6[%c0_25, %c0_26, %c0_27] : memref<1x8x1xf32, #tpu.memory_space<vmem>>, vector<1x8x1xf32>
      tpu.vector_store %arg6[%c0_25, %c0_26, %c0_27], %22 {strides = array<i32>} : memref<1x8x1xf32, #tpu.memory_space<vmem>>, vector<1x8x1xf32>,
    } else {
    }
    %c0_6 = arith.constant 0 : index
    %c0_7 = arith.constant 0 : index
    %c0_8 = arith.constant 0 : index
    %7 = vector.load %arg5[%c0_6, %c0_7, %c0_8] : memref<1x8x1xf32, #tpu.memory_space<vmem>>, vector<1x8x1xf32>
    %cst_9 = arith.constant dense<0.000000e+00> : vector<8xf32>
    %8 = vector.multi_reduction <add>, %2, %cst_9 [1] : vector<8x128xf32> to vector<8xf32>
    %9 = vector.shape_cast %8 : vector<8xf32> to vector<8x1xf32>
    %10 = vector.shape_cast %9 : vector<8x1xf32> to vector<1x8x1xf32>
    %11 = arith.addf %7, %10 : vector<1x8x1xf32>
    %c0_10 = arith.constant 0 : index
    %c0_11 = arith.constant 0 : index
    %c0_12 = arith.constant 0 : index
    %12 = vector.load %arg5[%c0_10, %c0_11, %c0_12] : memref<1x8x1xf32, #tpu.memory_space<vmem>>, vector<1x8x1xf32>
    tpu.vector_store %arg5[%c0_10, %c0_11, %c0_12], %11 {strides = array<i32>} : memref<1x8x1xf32, #tpu.memory_space<vmem>>, vector<1x8x1xf32>,
    %c0_13 = arith.constant 0 : index
    %c0_14 = arith.constant 0 : index
    %c0_15 = arith.constant 0 : index
    %13 = vector.load %arg6[%c0_13, %c0_14, %c0_15] : memref<1x8x1xf32, #tpu.memory_space<vmem>>, vector<1x8x1xf32>
    %14 = arith.mulf %2, %2 : vector<8x128xf32>
    %cst_16 = arith.constant dense<0.000000e+00> : vector<8xf32>
    %15 = vector.multi_reduction <add>, %14, %cst_16 [1] : vector<8x128xf32> to vector<8xf32>
    %16 = vector.shape_cast %15 : vector<8xf32> to vector<8x1xf32>
    %17 = vector.shape_cast %16 : vector<8x1xf32> to vector<1x8x1xf32>
    %18 = arith.addf %13, %17 : vector<1x8x1xf32>
    %c0_17 = arith.constant 0 : index
    %c0_18 = arith.constant 0 : index
    %c0_19 = arith.constant 0 : index
    %19 = vector.load %arg6[%c0_17, %c0_18, %c0_19] : memref<1x8x1xf32, #tpu.memory_space<vmem>>, vector<1x8x1xf32>
    tpu.vector_store %arg6[%c0_17, %c0_18, %c0_19], %18 {strides = array<i32>} : memref<1x8x1xf32, #tpu.memory_space<vmem>>, vector<1x8x1xf32>,
    return
  }
  func.func @transform_0(%arg0: i32, %arg1: i32) -> (i32, i32) {
    %c0_i32 = arith.constant 0 : i32
    %c0_i32_0 = arith.constant 0 : i32
    %c0_i32_1 = arith.constant 0 : i32
    return %c0_i32, %c0_i32_0 : i32, i32
  }
  func.func @transform_1(%arg0: i32, %arg1: i32) -> (i32, i32) {
    %c1_i32 = arith.constant 1 : i32
    %0 = arith.muli %arg0, %c1_i32 : i32
    %1 = arith.addi %0, %arg1 : i32
    %c0_i32 = arith.constant 0 : i32
    %c0_i32_0 = arith.constant 0 : i32
    return %c0_i32, %1 : i32, i32
  }
  func.func @transform_2(%arg0: i32, %arg1: i32) -> (i32, i32) {
    %c1_i32 = arith.constant 1 : i32
    %0 = arith.muli %arg0, %c1_i32 : i32
    %1 = arith.addi %0, %arg1 : i32
    %c0_i32 = arith.constant 0 : i32
    %c0_i32_0 = arith.constant 0 : i32
    return %c0_i32, %1 : i32, i32
  }
  func.func @transform_3(%arg0: i32, %arg1: i32) -> (i32, i32, i32) {
    %c0_i32 = arith.constant 0 : i32
    %c0_i32_0 = arith.constant 0 : i32
    %c0_i32_1 = arith.constant 0 : i32
    return %arg0, %c0_i32, %c0_i32_0 : i32, i32, i32
  }
  func.func @transform_4(%arg0: i32, %arg1: i32) -> (i32, i32, i32) {
    %c0_i32 = arith.constant 0 : i32
    %c0_i32_0 = arith.constant 0 : i32
    %c0_i32_1 = arith.constant 0 : i32
    return %arg0, %c0_i32, %c0_i32_0 : i32, i32, i32
  }
}

</mosaic_0001>

<bundles_post_ra>
// kernel: downsample1_forward.4
= control target key start
LH: loop header
LB: loop body
LE: loop exit
PB: predicated region body
PF: predicated region fallthrough
CT: control target
= control target key end

     0   :  { %vm51_vm0 = vcmask 523264   ;;  %vm80_vm1 = vcmask 7168   ;;  %v134_v9 = vmov 0.0   ;;  %s212_s1 = inlined_call_operand.vmem [shape: f32[64,128], index: 1, kind: input, shape index: {}]   ;;  %s213_s0 = inlined_call_operand.vmem [shape: f32[8,64], index: 0, kind: input, shape index: {}]   ;;  %s214_s3 = inlined_call_operand.vmem [shape: f32[1,8,1], index: 3, kind: output, shape index: {1}]   ;;  %s215_s4 = inlined_call_operand.vmem [shape: f32[1,8,1], index: 4, kind: output, shape index: {2}]   ;;  %s216_s2 = inlined_call_operand.vmem [shape: f32[8,128], index: 2, kind: output, shape index: {0}]  }
   0x1   :  { %v49_v0 = vld [vmem:[%s212_s1 + $0x38] sm:$0xff]  ;;  %v48_v1 = vld [vmem:[%s212_s1 + $0x30] sm:$0xff]  ;;  %v47_v2 = vld [vmem:[%s212_s1 + $0x28] sm:$0xff]  ;;  %81 = vst.msk [vmem:[%s214_s3] sm:$0xff] %vm80_vm1, %v134_v9 }
   0x2   :  { %63 = vmatpush.msra.mxu0 %v49_v0  ;;  %v46_v3 = vld [vmem:[%s212_s1 + $0x20] sm:$0xff]  ;;  %v45_v4 = vld [vmem:[%s212_s1 + $0x18] sm:$0xff]  ;;  %v44_v5 = vld [vmem:[%s212_s1 + $0x10] sm:$0xff]  ;;  %82 = vst.msk [vmem:[%s215_s4] sm:$0xff] %vm80_vm1, %v134_v9 }
   0x3   :  { %v43_v6 = vld [vmem:[%s212_s1 + $0x8] sm:$0xff]  ;;  %v42_v7 = vld [vmem:[%s212_s1] sm:$0xff] }
   0x4   :  { %64 = vmatpush.msra.mxu0 %v48_v1  ;;  %v50_v8 = vld [vmem:[%s213_s0] sm:$0xff] }
   0x6   :  { %65 = vmatpush.msra.mxu0 %v47_v2 }
   0x8   :  { %66 = vmatpush.msra.mxu0 %v46_v3  ;;  %v83_v12 = vld [vmem:[%s214_s3] sm:$0xff] }
   0x9   :  { %v89_v15 = vld [vmem:[%s215_s4] sm:$0xff] }
   0xa   :  { %67 = vmatpush.msra.mxu0 %v45_v4 }
   0xc   :  { %68 = vmatpush.msra.mxu0 %v44_v5 }
   0xe   :  { %69 = vmatpush.msra.mxu0 %v43_v6 }
  0x10   :  { %70 = vmatpush.msra.mxu0 %v42_v7 }
  0x11   :  { %132 = vmatmul.msk.f32.vlgmr.msra.gmra.mxu0 %vm51_vm0, %v50_v8 }
  0x8e   :  { %v72_v10 = vpop.f32.mrf.mxu0 }
  0x8f   :  { %75 = vst [vmem:[%s216_s2] sm:$0xff] %v72_v10  ;;  %84 = vadd.xlane.f32.xlu0 %v72_v10  ;;  %v90_v11 = vmul.f32 %v72_v10, %v72_v10 }
  0x97   :  { %91 = vadd.xlane.f32.xlu0 %v90_v11 }
 0x102   :  { %v85_v13 = vpop.xlane.xlu0 %84 }
 0x103   :  { %v86_v14 = vadd.f32 %v85_v13, %v83_v12 }
 0x105   :  { %88 = vst.msk [vmem:[%s214_s3] sm:$0xff] %vm80_vm1, %v86_v14 }
 0x10a   :  { %v92_v16 = vpop.xlane.xlu0 %91 }
 0x10b   :  { %v93_v17 = vadd.f32 %v92_v16, %v89_v15 }
 0x10d   :  { %94 = vst.msk [vmem:[%s215_s4] sm:$0xff] %vm80_vm1, %v93_v17 }

// kernel: downsample1_forward.5
= control target key start
LH: loop header
LB: loop body
LE: loop exit
PB: predicated region body
PF: predicated region fallthrough
CT: control target
= control target key end

     0   :  { %v39_v0 = vmov 0   ;;  %s72_s1 = inlined_call_operand.vmem [shape: f32[8,1], index: 1, kind: input, shape index: {}]   ;;  %s73_s2 = inlined_call_operand.vmem [shape: f32[8,1], index: 2, kind: input, shape index: {}]   ;;  %s74_s0 = inlined_call_operand.vmem [shape: f32[8,128], index: 0, kind: input, shape index: {}, may-alias: {0,3}]   ;;  %s75_s3 = inlined_call_operand.vmem [shape: f32[8,128], index: 3, kind: output, shape index: {}, may-alias: {0,3}]  }
   0x1   :  { %38 = vset.pattern.permute.xlu0 %v39_v0  ;;  %v15_v1 = vld [vmem:[%s72_s1] sm:$0xff] }
   0x2   :  { %18 = vperm.xlu0 %38, %v15_v1   ;;  %v22_v2 = vld [vmem:[%s73_s2] sm:$0xff] }
   0x3   :  { %v14_v4 = vld [vmem:[%s74_s0] sm:$0xff] }
   0xa   :  { %25 = vperm.xlu0 %38, %v22_v2  }
  0x74   :  { %v19_v3 = vpop.permute.xlu0 %18 }
  0x75   :  { %v21_v5 = vmul.f32 %v19_v3, %v14_v4 }
  0x7c   :  { %v26_v6 = vpop.permute.xlu0 %25 }
  0x7d   :  { %v28_v7 = vadd.f32 %v26_v6, %v21_v5 }
  0x7f   :  { %vm29_vm0 = vcmp.ge.f32.partialorder %v28_v7, 0.0  ;;  %v30_v8 = vmul.f32 0.2, %v28_v7 }
  0x81   :  { %v31_v9 = vsel %vm29_vm0, %v28_v7, %v30_v8 }
  0x82   :  { %32 = vst [vmem:[%s75_s3] sm:$0xff] %v31_v9 }

// kernel: downsample1_forward.6
= control target key start
LH: loop header
LB: loop body
LE: loop exit
PB: predicated region body
PF: predicated region fallthrough
CT: control target
= control target key end

     0   :  { %vm52_vm0 = vcmask 588800   ;;  %vm81_vm1 = vcmask 7168   ;;  %v135_v10 = vmov 0.0   ;;  %s216_s1 = inlined_call_operand.vmem [shape: f32[72,128], index: 1, kind: input, shape index: {}]   ;;  %s217_s0 = inlined_call_operand.vmem [shape: f32[8,72], index: 0, kind: input, shape index: {}]   ;;  %s218_s3 = inlined_call_operand.vmem [shape: f32[1,8,1], index: 3, kind: output, shape index: {1}]   ;;  %s219_s4 = inlined_call_operand.vmem [shape: f32[1,8,1], index: 4, kind: output, shape index: {2}]   ;;  %s220_s2 = inlined_call_operand.vmem [shape: f32[8,128], index: 2, kind: output, shape index: {0}]  }
   0x1   :  { %v50_v0 = vld [vmem:[%s216_s1 + $0x40] sm:$0xff]  ;;  %v49_v1 = vld [vmem:[%s216_s1 + $0x38] sm:$0xff]  ;;  %v48_v2 = vld [vmem:[%s216_s1 + $0x30] sm:$0xff]  ;;  %82 = vst.msk [vmem:[%s218_s3] sm:$0xff] %vm81_vm1, %v135_v10 }
   0x2   :  { %63 = vmatpush.msra.mxu0 %v50_v0  ;;  %v47_v3 = vld [vmem:[%s216_s1 + $0x28] sm:$0xff]  ;;  %v46_v4 = vld [vmem:[%s216_s1 + $0x20] sm:$0xff]  ;;  %v45_v5 = vld [vmem:[%s216_s1 + $0x18] sm:$0xff]  ;;  %83 = vst.msk [vmem:[%s219_s4] sm:$0xff] %vm81_vm1, %v135_v10 }
   0x3   :  { %v44_v6 = vld [vmem:[%s216_s1 + $0x10] sm:$0xff]  ;;  %v43_v7 = vld [vmem:[%s216_s1 + $0x8] sm:$0xff]  ;;  %v42_v8 = vld [vmem:[%s216_s1] sm:$0xff] }
   0x4   :  { %64 = vmatpush.msra.mxu0 %v49_v1  ;;  %v51_v9 = vld [vmem:[%s217_s0] sm:$0xff] }
   0x6   :  { %65 = vmatpush.msra.mxu0 %v48_v2 }
   0x8   :  { %66 = vmatpush.msra.mxu0 %v47_v3  ;;  %v84_v13 = vld [vmem:[%s218_s3] sm:$0xff] }
   0x9   :  { %v90_v16 = vld [vmem:[%s219_s4] sm:$0xff] }
   0xa   :  { %67 = vmatpush.msra.mxu0 %v46_v4 }
   0xc   :  { %68 = vmatpush.msra.mxu0 %v45_v5 }
   0xe   :  { %69 = vmatpush.msra.mxu0 %v44_v6 }
  0x10   :  { %70 = vmatpush.msra.mxu0 %v43_v7 }
  0x12   :  { %71 = vmatpush.msra.mxu0 %v42_v8 }
  0x13   :  { %133 = vmatmul.msk.f32.vlgmr.msra.gmra.mxu0 %vm52_vm0, %v51_v9 }
  0x90   :  { %v73_v11 = vpop.f32.mrf.mxu0 }
  0x91   :  { %76 = vst [vmem:[%s220_s2] sm:$0xff] %v73_v11  ;;  %85 = vadd.xlane.f32.xlu0 %v73_v11  ;;  %v91_v12 = vmul.f32 %v73_v11, %v73_v11 }
  0x99   :  { %92 = vadd.xlane.f32.xlu0 %v91_v12 }
 0x104   :  { %v86_v14 = vpop.xlane.xlu0 %85 }
 0x105   :  { %v87_v15 = vadd.f32 %v86_v14, %v84_v13 }
 0x107   :  { %89 = vst.msk [vmem:[%s218_s3] sm:$0xff] %vm81_vm1, %v87_v15 }
 0x10c   :  { %v93_v17 = vpop.xlane.xlu0 %92 }
 0x10d   :  { %v94_v18 = vadd.f32 %v93_v17, %v90_v16 }
 0x10f   :  { %95 = vst.msk [vmem:[%s219_s4] sm:$0xff] %vm81_vm1, %v94_v18 }

</bundles_post_ra>
